<compile_context>
chip_gen: v5e
topology: v5e:2x2
jax: 0.10.0
libtpu: 0.0.40
codegen_flags: <defaults>
</compile_context>

<pallas_src>
import functools

import jax
import jax.numpy as jnp
from jax.experimental import pallas as pl
from jax.experimental.pallas import tpu as pltpu


def _round_up(x: int, m: int) -> int:
    return ((x + m - 1) // m) * m


def _output_layer_kernel(x_ref, w_ref, b_ref, o_ref, *, log_softmax: bool):
    # x_ref: (TN, H)   w_ref: (C, H)   b_ref: (C, 1)   o_ref: (C, TN)
    # logits^T = W @ x^T, produced directly in the lane-dense (C, TN) layout:
    # contract H (dim 1 of both operands) on the MXU, accumulate in f32.
    logits = jax.lax.dot_general(
        w_ref[...],
        x_ref[...],
        dimension_numbers=(((1,), (1,)), ((), ())),
        preferred_element_type=jnp.float32,
    ) + b_ref[...]
    if log_softmax:
        # LogSoftmax over the class axis (axis 0 in the transposed layout).
        # Purely per-column (= per input row), so row tiling / partial trailing
        # blocks are safe.
        m = jnp.max(logits, axis=0, keepdims=True)
        z = logits - m
        lse = jnp.log(jnp.sum(jnp.exp(z), axis=0, keepdims=True))
        o_ref[...] = (z - lse).astype(o_ref.dtype)
    else:
        o_ref[...] = logits.astype(o_ref.dtype)


def output_layer_forward(
    x,
    weight,
    bias,
    *,
    log_softmax: bool,
    block_rows: int = 2048,
    use_xla_fast_path: bool = False,
):
    """Pallas forward for OutputLayer.

    x:      (N, H)  float32
    weight: (C, H)  float32   (PyTorch nn.Linear convention, NOT transposed)
    bias:   (C,)    float32
    returns (N, C) float32 -- logits (regression) or log-probs (classification)
    """
    n, h = x.shape
    c, h_w = weight.shape
    assert h == h_w, "weight must be (C, H) matching x's feature dim"

    # Tiny-batch fast path: with C of 1..few classes the per-call pallas/DMA
    # setup cost exceeds the useful work; plain XLA is faster.  Off by default.
    if use_xla_fast_path and n <= 256:
        logits = x @ weight.T + bias
        return jax.nn.log_softmax(logits, axis=1) if log_softmax else logits

    itemsize = jnp.dtype(x.dtype).itemsize

    # Row-tile size: keep the double-buffered x tiles under ~8 MiB so the total
    # working set fits every generation's scoped VMEM (v5e 16 MiB default,
    # v7x 64 MiB physical / 32 MiB default) while staying big enough to
    # amortize the ~0.35 us per-grid-step overhead.
    x_tile_budget = 8 * 1024 * 1024
    tn_cap = min(block_rows, x_tile_budget // (2 * h * itemsize))
    tn_cap = max(128, (tn_cap // 128) * 128)

    if n <= tn_cap:
        # Single block covering the whole array: block dims == array dims, so
        # no padding and no (8,128) divisibility requirement at all.
        tn = n
        grid = (1,)
    else:
        # Multi-tile: tn is a multiple of 128 (legal block shape for both the
        # (N, H) input and the (C, N) output); Pallas handles the partial
        # trailing block, no wrapper-side padding or cropping.
        tn = tn_cap
        grid = (pl.cdiv(n, tn),)

    b2d = bias.reshape(c, 1)  # (C, 1): broadcasts over the lane (batch) axis
    kernel = functools.partial(_output_layer_kernel, log_softmax=log_softmax)

    # Explicit VMEM limit sized from the actual working set (+ headroom).
    vmem_need = (
        2 * tn * h * itemsize      # double-buffered x tiles
        + 2 * c * tn * 4           # double-buffered output tiles (f32)
        + c * h * itemsize         # VMEM-resident weight
        + c * 4                    # VMEM-resident bias
    )
    vmem_limit = int(min(max(vmem_need + (4 << 20), 8 << 20), 64 << 20))

    cost = pl.CostEstimate(
        flops=2 * n * h * c,
        transcendentals=(n * (c + 1)) if log_softmax else 0,
        bytes_accessed=itemsize * (n * h + c * h) + 4 * (c + n * c),
    )

    out_t = pl.pallas_call(
        kernel,
        out_shape=jax.ShapeDtypeStruct((c, n), x.dtype),
        grid=grid,
        in_specs=[
            pl.BlockSpec((tn, h), lambda i: (i, 0)),   # x: tiled over rows
            pl.BlockSpec((c, h), lambda i: (0, 0)),    # weight: VMEM-resident
            pl.BlockSpec((c, 1), lambda i: (0, 0)),    # bias: VMEM-resident
        ],
        # Lane-dense transposed output: full-lane unmasked stores.
        out_specs=pl.BlockSpec((c, tn), lambda i: (0, i)),
        compiler_params=pltpu.CompilerParams(
            # Row tiles are independent -> shard across TCs on v7x megacore.
            dimension_semantics=("parallel",),
            vmem_limit_bytes=vmem_limit,
        ),
        cost_estimate=cost,
    )(x, weight, b2d)

    # Tiny (C, N) -> (N, C) transpose in the wrapper (C is 1..few classes).
    return out_t.T


def make_output_layer_params(key, h_fea_len, task_tp):
    """Deterministic synthetic parameters matching OutputLayer.__init__."""
    if "classification" in task_tp:
        try:
            output_size = int(task_tp.split("_")[-1])
        except Exception:
            output_size = 2
        log_softmax = True
    else:
        output_size = 1
        log_softmax = False

    k_w, k_b = jax.random.split(key)
    # nn.Linear-style bounded uniform init (deterministic, synthetic).
    bound = 1.0 / jnp.sqrt(h_fea_len)
    weight = jax.random.uniform(
        k_w, (output_size, h_fea_len), jnp.float32, -bound, bound
    )
    bias = jax.random.uniform(k_b, (output_size,), jnp.float32, -bound, bound)
    return weight, bias, log_softmax


def _reference(x, weight, bias, log_softmax):
    logits = x @ weight.T + bias
    if log_softmax:
        return jax.nn.log_softmax(logits, axis=1)
    return logits


if __name__ == "__main__":
    key = jax.random.PRNGKey(0)
    k_x, k_x2, k_x3, k_p1, k_p2 = jax.random.split(key, 5)

    batch, h_fea_len = 8, 32
    x = jax.random.normal(k_x, (batch, h_fea_len), jnp.float32)

    # --- classification variant: Linear(32 -> 3) + LogSoftmax(dim=1) ---
    w_c, b_c, ls_c = make_output_layer_params(k_p1, h_fea_len, "classification_3")
    out_cls = output_layer_forward(x, w_c, b_c, log_softmax=ls_c)
    out_cls = jax.block_until_ready(out_cls)
    ref_cls = _reference(x, w_c, b_c, ls_c)
    assert out_cls.shape == (batch, 3)
    assert jnp.allclose(out_cls, ref_cls, atol=1e-5, rtol=1e-5)

    # --- regression variant: Linear(32 -> 1) ---
    w_r, b_r, ls_r = make_output_layer_params(k_p2, h_fea_len, "regression")
    out_reg = output_layer_forward(x, w_r, b_r, log_softmax=ls_r)
    out_reg = jax.block_until_ready(out_reg)
    ref_reg = _reference(x, w_r, b_r, ls_r)
    assert out_reg.shape == (batch, 1)
    assert jnp.allclose(out_reg, ref_reg, atol=1e-5, rtol=1e-5)

    # --- ragged batch (single full-array block, no padding anywhere) ---
    batch2 = 10  # not a multiple of 8
    x2 = jax.random.normal(k_x2, (batch2, h_fea_len), jnp.float32)
    out2 = output_layer_forward(x2, w_c, b_c, log_softmax=ls_c)
    out2 = jax.block_until_ready(out2)
    ref2 = _reference(x2, w_c, b_c, ls_c)
    assert out2.shape == (batch2, 3)
    assert jnp.allclose(out2, ref2, atol=1e-5, rtol=1e-5)

    # --- multi-tile path with a partial trailing block (200 rows, 128-row tile) ---
    batch3 = 200
    x3 = jax.random.normal(k_x3, (batch3, h_fea_len), jnp.float32)
    out3 = output_layer_forward(x3, w_c, b_c, log_softmax=ls_c, block_rows=128)
    out3 = jax.block_until_ready(out3)
    ref3 = _reference(x3, w_c, b_c, ls_c)
    assert out3.shape == (batch3, 3)
    assert jnp.allclose(out3, ref3, atol=1e-5, rtol=1e-5)

    # --- tiny-batch XLA fast path (optional; Pallas paths above already ran) ---
    out_fp = output_layer_forward(
        x, w_c, b_c, log_softmax=ls_c, use_xla_fast_path=True
    )
    out_fp = jax.block_until_ready(out_fp)
    assert jnp.allclose(out_fp, ref_cls, atol=1e-5, rtol=1e-5)

    print("KERNEL_OK")
</pallas_src>

<mosaic_0001>
module attributes {stable_mosaic.version = 11 : i64} {
  func.func @_output_layer_kernel(%arg0: i32, %arg1: memref<8x32xf32, #tpu.memory_space<vmem>>, %arg2: memref<3x32xf32, #tpu.memory_space<vmem>>, %arg3: memref<3x1xf32, #tpu.memory_space<vmem>>, %arg4: memref<3x8xf32, #tpu.memory_space<vmem>>) attributes {dimension_semantics = [#tpu.dimension_semantics<parallel>], iteration_bounds = array<i64: 1>, scalar_prefetch = 0 : i64, scratch_operands = 0 : i64, tpu.core_type = #tpu.core_type<tc>, window_params = [{transform_indices = @transform_0, window_bounds = array<i64: 8, 32>}, {pipeline_mode = #tpu.pipeline_mode<synchronous>, transform_indices = @transform_1, window_bounds = array<i64: 3, 32>}, {pipeline_mode = #tpu.pipeline_mode<synchronous>, transform_indices = @transform_2, window_bounds = array<i64: 3, 1>}, {transform_indices = @transform_3, window_bounds = array<i64: 3, 8>}]} {
    %c0 = arith.constant 0 : index
    %c0_0 = arith.constant 0 : index
    %0 = vector.load %arg2[%c0, %c0_0] : memref<3x32xf32, #tpu.memory_space<vmem>>, vector<3x32xf32>
    %c0_1 = arith.constant 0 : index
    %c0_2 = arith.constant 0 : index
    %1 = vector.load %arg1[%c0_1, %c0_2] : memref<8x32xf32, #tpu.memory_space<vmem>>, vector<8x32xf32>
    %cst = arith.constant dense<0.000000e+00> : vector<3x8xf32>
    %2 = tpu.matmul %0, %1, %cst {dimension_numbers = #tpu.dot_dimension_numbers<[1], [1], [0], [0], [0, 0, 1, 0], [], []>} : vector<3x32xf32>, vector<8x32xf32>, vector<3x8xf32> -> vector<3x8xf32>
    %c0_3 = arith.constant 0 : index
    %c0_4 = arith.constant 0 : index
    %3 = vector.load %arg3[%c0_3, %c0_4] : memref<3x1xf32, #tpu.memory_space<vmem>>, vector<3x1xf32>
    %4 = vector.broadcast %3 : vector<3x1xf32> to vector<3x8xf32>
    %5 = arith.addf %2, %4 : vector<3x8xf32>
    %cst_5 = arith.constant dense<0xFF800000> : vector<8xf32>
    %6 = vector.multi_reduction <maximumf>, %5, %cst_5 [0] : vector<3x8xf32> to vector<8xf32>
    %7 = vector.shape_cast %6 : vector<8xf32> to vector<1x8xf32>
    %8 = vector.broadcast %7 : vector<1x8xf32> to vector<3x8xf32>
    %9 = arith.subf %5, %8 : vector<3x8xf32>
    %10 = math.exp %9 : vector<3x8xf32>
    %cst_6 = arith.constant dense<0.000000e+00> : vector<8xf32>
    %11 = vector.multi_reduction <add>, %10, %cst_6 [0] : vector<3x8xf32> to vector<8xf32>
    %12 = vector.shape_cast %11 : vector<8xf32> to vector<1x8xf32>
    %13 = math.log %12 : vector<1x8xf32>
    %14 = vector.broadcast %13 : vector<1x8xf32> to vector<3x8xf32>
    %15 = arith.subf %9, %14 : vector<3x8xf32>
    %c0_7 = arith.constant 0 : index
    %c0_8 = arith.constant 0 : index
    %16 = vector.load %arg4[%c0_7, %c0_8] : memref<3x8xf32, #tpu.memory_space<vmem>>, vector<3x8xf32>
    tpu.vector_store %arg4[%c0_7, %c0_8], %15 {strides = array<i32>} : memref<3x8xf32, #tpu.memory_space<vmem>>, vector<3x8xf32>,
    return
  }
  func.func @transform_0(%arg0: i32) -> (i32, i32) {
    %c0_i32 = arith.constant 0 : i32
    %c0_i32_0 = arith.constant 0 : i32
    return %arg0, %c0_i32 : i32, i32
  }
  func.func @transform_1(%arg0: i32) -> (i32, i32) {
    %c0_i32 = arith.constant 0 : i32
    %c0_i32_0 = arith.constant 0 : i32
    %c0_i32_1 = arith.constant 0 : i32
    return %c0_i32, %c0_i32_0 : i32, i32
  }
  func.func @transform_2(%arg0: i32) -> (i32, i32) {
    %c0_i32 = arith.constant 0 : i32
    %c0_i32_0 = arith.constant 0 : i32
    %c0_i32_1 = arith.constant 0 : i32
    return %c0_i32, %c0_i32_0 : i32, i32
  }
  func.func @transform_3(%arg0: i32) -> (i32, i32) {
    %c0_i32 = arith.constant 0 : i32
    %c0_i32_0 = arith.constant 0 : i32
    return %c0_i32, %arg0 : i32, i32
  }
}

</mosaic_0001>

<bundles_post_ra>
// kernel: tpu_custom_call.1
= control target key start
LH: loop header
LB: loop body
LE: loop exit
PB: predicated region body
PF: predicated region fallthrough
CT: control target
= control target key end

     0   :  { %8 = vsyncpa [#allocation3], 0  ;;  %s203_s0 = inlined_call_operand.hbm [shape: f32[8,32], index: 0, kind: input, shape index: {}]   ;;  %s204_s1 = inlined_call_operand.vmem [shape: f32[3,32], index: 1, kind: input, shape index: {}]   ;;  %s205_s2 = inlined_call_operand.vmem [shape: f32[3,1], index: 2, kind: input, shape index: {}]   ;;  %s206_s3 = inlined_call_operand.hbm [shape: f32[3,8], index: 3, kind: output, shape index: {}]  }
   0x1   :  { %9 = vsyncpa [#allocation4], 0  ;;  %s15_s14 = sshll.u32 %s203_s0, 4  ;;  %s165_s15 = smov [#allocation2]   ;;  %s16_s14 = int_to_ptr.hbm [resolvable:$true] %s15_s14 }
   0x2   :  { %s17_s16 = sshll.u32 %s165_s15, 4  ;;  %s18_s16 = int_to_ptr.vmem [resolvable:$true] %s17_s16 }
   0x3   :  { %20 = dma.hbm_to_vmem [thread:$0]  %s16_s14, 128, %s18_s16, [#allocation3]  }
   0x4   :  { %161 = dma.done.wait [#allocation3], 128  }
   0x5   :  { %162 = vsyncadd [#allocation3], 4294967168  ;;  %v166_v0 = vmov 0   ;;  %vm37_vm0 = vcmask 261120   ;;  %v30_v1 = vld [vmem:[#allocation2] sm:$0xff]  ;;  %vm64_vm1 = vcmask 59392  }
   0x6   :  { %108 = vset.pattern.permute.xlu0 %v166_v0  ;;  %v31_v2 = vld [vmem:[%s205_s2] sm:$0x7]  ;;  %103 = vmatpush.xpose.msk.msra.mxu0 %vm37_vm0, %v30_v1  ;;  %s167_s0 = smov [#allocation5]   ;;  %s93_s22 = sshll.u32 %s206_s3, 4  ;;  %s94_s22 = int_to_ptr.hbm [resolvable:$true] %s93_s22 }
   0x7   :  { %v29_v3 = vld [vmem:[%s204_s1] sm:$0x7]  ;;  %34 = vperm.xlu0 %108, %v31_v2   ;;  %s91_s1 = sshll.u32 %s167_s0, 4  ;;  %s92_s1 = int_to_ptr.vmem [resolvable:$true] %s91_s1 }
   0x9   :  { %104 = vmatmul.msk.f32.vlgmr.msra.gmra.mxu0 %vm37_vm0, %v29_v3 }
  0x79   :  { %v35_v4 = vpop.permute.xlu0 %34 }
  0x86   :  { %v61_v5 = vpop.f32.mrf.mxu0 }
  0x87   :  { %v62_v6 = vadd.f32 %v61_v5, %v35_v4 }
  0x89   :  { %v65_v7 = vsel %vm64_vm1, %v62_v6, -inf }
  0x8a   :  { %v66_v8 = vrot.slane %v65_v7, 4 }
  0x8c   :  { %v67_v9 = vmax.f32 %v65_v7, %v66_v8 }
  0x8e   :  { %v68_v10 = vrot.slane %v67_v9, 2 }
  0x90   :  { %v69_v11 = vmax.f32 %v67_v9, %v68_v10 }
  0x92   :  { %v70_v12 = vrot.slane %v69_v11, 1 }
  0x94   :  { %v71_v13 = vmax.f32 %v69_v11, %v70_v12 }
  0x96   :  { %v72_v14 = vsub.f32 %v62_v6, %v71_v13 }
  0x98   :  { %v73_v15 = vmul.f32 1.442695, %v72_v14 }
  0x9a   :  { %109 = vpow2.f32 %v73_v15 }
  0xa0   :  { %v110_v16 = vpop.eup %109 }
  0xa1   :  { %v75_v17 = vsel %vm64_vm1, %v110_v16, 0.0 }
  0xa2   :  { %v76_v18 = vrot.slane %v75_v17, 4 }
  0xa4   :  { %v77_v19 = vadd.f32 %v76_v18, %v75_v17 }
  0xa6   :  { %v78_v20 = vrot.slane %v77_v19, 2 }
  0xa8   :  { %v79_v21 = vadd.f32 %v78_v20, %v77_v19 }
  0xaa   :  { %v80_v22 = vrot.slane %v79_v21, 1 }
  0xac   :  { %v81_v23 = vadd.f32 %v80_v22, %v79_v21 }
  0xae   :  { %111 = vlog2.f32 %v81_v23 }
  0xb4   :  { %v112_v24 = vpop.eup %111 }
  0xb5   :  { %v83_v25 = vmul.f32 0.6931472, %v112_v24 }
  0xb7   :  { %v84_v26 = vsub.f32 %v72_v14, %v83_v25 }
  0xb9   :  { %85 = vst.msk [vmem:[#allocation5] sm:$0x7] %vm64_vm1, %v84_v26 }
  0xba   :  { %96 = dma.vmem_to_hbm [thread:$0]  %s92_s1, 64, %s94_s22, [#allocation4]  }
  0xbb   :  { %163 = dma.done.wait [#allocation4], 64  }
  0xbc   :  { %164 = vsyncadd [#allocation4], 4294967232 }
  0xbd   :  { %101 = vsyncpa [#allocation3], 1 }
  0xbe   :  { %102 = vsyncpa [#allocation4], 1 }

</bundles_post_ra>
